<compile_context>
chip_gen: v7x
topology: tpu7x:2x2x1
jax: 0.10.0
libtpu: 0.0.40
codegen_flags: <defaults>
</compile_context>

<pallas_src>
import numpy as np
import jax
import jax.numpy as jnp
from jax.experimental import pallas as pl
from jax.experimental.pallas import tpu as pltpu

_LANES = 128
_SUBLANES = 8
_GRAN = _LANES * _SUBLANES  # 1024: minimum tile granularity (full vregs)


def make_bernstein_buffers(num_basis_functions: int):
    """Deterministic buffer setup, identical to the PyTorch __init__ (float64)."""
    logfactorial = np.zeros(num_basis_functions, dtype=np.float64)
    for i in range(2, num_basis_functions):
        logfactorial[i] = logfactorial[i - 1] + np.log(i)
    v = np.arange(0, num_basis_functions, dtype=np.float64)
    n = num_basis_functions - 1 - v
    logbinomial = (logfactorial[-1] - logfactorial[v.astype(np.int64)]
                   - logfactorial[n.astype(np.int64)])
    # (K, 1, 1): K on the leading (untiled) axis, broadcasts against the
    # (rows, lanes) distance tiles inside the kernel.
    return (
        logbinomial.astype(np.float32)[:, None, None],
        n.astype(np.float32)[:, None, None],
        v.astype(np.float32)[:, None, None],
    )


def _bernstein_kernel(cutoff: float):
    """Returns the Pallas kernel body with `cutoff` / 1/cutoff baked in."""
    cutoff = float(cutoff)
    inv_cutoff = 1.0 / cutoff

    def kernel(r_ref, logc_ref, n_ref, v_ref, out_ref):
        r = r_ref[...]            # (TR, 128)  dense-packed distances
        logc = logc_ref[...]      # (K, 1, 1)  resident coefficients
        nb = n_ref[...]           # (K, 1, 1)
        vb = v_ref[...]           # (K, 1, 1)

        # Guard the logs: elements with r <= 0 or r >= cutoff must come out as
        # exact 0.  Use a safe dummy so no NaN is ever generated, and fold the
        # mask into the exponent as -inf (exp(-inf) == 0), so no (K,TR,128)
        # select is needed on the wide path.
        inside = jnp.logical_and(r > 0.0, r < cutoff)            # (TR, 128)
        r_safe = jnp.where(inside, r, 0.5 * cutoff)              # (TR, 128)

        r_over_c = r_safe * inv_cutoff                           # no divide
        x = jnp.log(r_over_c)                                    # (TR, 128)
        # -expm1(log(r/c)) == 1 - r/c, so one log1p replaces expm1 + log.
        log_one_minus = jnp.log1p(-r_over_c)                     # (TR, 128)
        # Smooth cutoff folded into the exponent (keep the divide exact):
        #   f(r) = exp(-r^2 / ((c - r)(c + r)))
        s = -(r_safe * r_safe) / ((cutoff - r_safe) * (cutoff + r_safe))
        s = jnp.where(inside, s, -jnp.inf)                       # mask -> exp=0

        # (K,1,1) broadcast against (1,TR,128) -> (K,TR,128); one exp/element.
        y = logc + nb * x[None] + vb * log_one_minus[None] + s[None]
        out_ref[...] = jnp.exp(y)

    return kernel


def bernstein_rbf(r, logc, n, v, cutoff, *, tile_n=8192, layout="nk"):
    """Bernstein RBF expansion.

    r: (N,) or (N,1) f32 distances; logc/n/v: Bernstein buffers (any shape
    reshapable to (K,)).  layout="nk" returns the PyTorch-layout (N, K);
    layout="kn" returns (K, N) transpose-free (preferred when the consumer can
    contract over the trailing axis, avoiding an HBM round-trip transpose).
    """
    r = jnp.asarray(r, jnp.float32).reshape(-1)
    N = int(r.shape[0])
    logc = jnp.asarray(logc, jnp.float32).reshape(-1, 1, 1)
    n = jnp.asarray(n, jnp.float32).reshape(-1, 1, 1)
    v = jnp.asarray(v, jnp.float32).reshape(-1, 1, 1)
    K = int(logc.shape[0])
    cutoff = float(cutoff)

    # --- tiling: dense (TR, 128) distance blocks, TR a multiple of 8 ---------
    n_gran = pl.cdiv(max(N, 1), _GRAN)                  # granules of 1024 elems
    tile_n = max(_GRAN, (int(tile_n) // _GRAN) * _GRAN)  # multiple of 1024
    tile_n = min(tile_n, n_gran * _GRAN)                 # don't exceed the data
    if n_gran >= 2:
        # keep >= 2 grid steps so dimension_semantics=("parallel",) can use
        # both v7x TensorCores (no-op on v5e/v6e single-TC chips).
        tile_n = max(_GRAN, min(tile_n, (n_gran // 2) * _GRAN))
    n_pad = pl.cdiv(max(N, 1), tile_n) * tile_n
    tr = tile_n // _LANES                                # rows per tile (mult of 8)
    grid = (n_pad // tile_n,)

    # Padded elements get r = cutoff + 1 -> masked to exact 0 in-kernel.
    r_pad = jnp.pad(r, (0, n_pad - N), constant_values=cutoff + 1.0)
    r2 = r_pad.reshape(n_pad // _LANES, _LANES)          # dense vreg packing

    cost = pl.CostEstimate(
        flops=(4 * K + 10) * n_pad,
        transcendentals=(K + 2) * n_pad,
        bytes_accessed=4 * (n_pad + K * n_pad + 3 * K),
    )

    out3 = pl.pallas_call(
        _bernstein_kernel(cutoff),
        out_shape=jax.ShapeDtypeStruct((K, n_pad // _LANES, _LANES), jnp.float32),
        grid_spec=pl.GridSpec(
            grid=grid,
            in_specs=[
                pl.BlockSpec((tr, _LANES), lambda i: (i, 0)),      # r (dense)
                pl.BlockSpec((K, 1, 1), lambda i: (0, 0, 0)),      # logc (resident)
                pl.BlockSpec((K, 1, 1), lambda i: (0, 0, 0)),      # n
                pl.BlockSpec((K, 1, 1), lambda i: (0, 0, 0)),      # v
            ],
            out_specs=pl.BlockSpec((K, tr, _LANES), lambda i: (0, i, 0)),
        ),
        compiler_params=pltpu.CompilerParams(
            dimension_semantics=("parallel",),
        ),
        cost_estimate=cost,
    )(r2, logc, n, v)

    # (K, R, 128) -> (K, N): free row-major reshape + lane-padding slice.
    out_kn = out3.reshape(K, n_pad)[:, :N]
    if layout == "kn":
        return out_kn
    # TODO(synk): for large N, prefer layout="kn" (or fuse the downstream K->F
    # projection into the kernel) to avoid this HBM round-trip transpose.
    return out_kn.T  # (N, K): matches the PyTorch module's output layout


def bernstein_rbf_ref(r, logc, n, v, cutoff):
    """Pure-JAX reference mirroring the PyTorch forward (with masked cutoff)."""
    cutoff = float(cutoff)
    r = jnp.asarray(r, jnp.float32).reshape(-1, 1)          # (N, 1)
    logc = jnp.asarray(logc, jnp.float32).reshape(1, -1)
    nb = jnp.asarray(n, jnp.float32).reshape(1, -1)
    vb = jnp.asarray(v, jnp.float32).reshape(1, -1)
    inside = jnp.logical_and(r > 0.0, r < cutoff)
    r_safe = jnp.where(inside, r, 0.5 * cutoff)
    x = jnp.log(r_safe / cutoff)
    y = logc + nb * x + vb * jnp.log(-jnp.expm1(x))          # original formula
    fc = jnp.exp(-(r_safe * r_safe) / ((cutoff - r_safe) * (cutoff + r_safe)))
    return jnp.where(inside, fc * jnp.exp(y), 0.0)


if __name__ == "__main__":
    num_basis_functions = 16
    cutoff = 5.0
    N = 4096  # number of edge distances (>=2 grid steps after tile capping)

    logc_np, n_np, v_np = make_bernstein_buffers(num_basis_functions)
    logc = jnp.asarray(logc_np)   # (K, 1, 1)
    n = jnp.asarray(n_np)         # (K, 1, 1)
    v = jnp.asarray(v_np)         # (K, 1, 1)

    key = jax.random.PRNGKey(0)
    # Include distances beyond the cutoff to exercise the masked (zero) branch.
    r = jax.random.uniform(key, (N, 1), dtype=jnp.float32,
                           minval=0.05, maxval=cutoff + 1.0)

    out = jax.block_until_ready(bernstein_rbf(r, logc, n, v, cutoff))        # (N, K)
    ref = jax.block_until_ready(bernstein_rbf_ref(r, logc, n, v, cutoff))    # (N, K)
    np.testing.assert_allclose(np.asarray(out), np.asarray(ref),
                               rtol=2e-5, atol=1e-6)

    # Transpose-free (K, N) layout recommended for fused downstream consumers.
    out_kn = jax.block_until_ready(
        bernstein_rbf(r, logc, n, v, cutoff, layout="kn"))
    np.testing.assert_allclose(np.asarray(out_kn), np.asarray(ref).T,
                               rtol=2e-5, atol=1e-6)

    print("KERNEL_OK")
</pallas_src>

<mosaic_0001>
module attributes {stable_mosaic.version = 11 : i64} {
  func.func @kernel(%arg0: i32, %arg1: memref<16x128xf32, #tpu.memory_space<vmem>>, %arg2: memref<16x1x1xf32, #tpu.memory_space<vmem>>, %arg3: memref<16x1x1xf32, #tpu.memory_space<vmem>>, %arg4: memref<16x1x1xf32, #tpu.memory_space<vmem>>, %arg5: memref<16x16x128xf32, #tpu.memory_space<vmem>>) attributes {dimension_semantics = [#tpu.dimension_semantics<parallel>], iteration_bounds = array<i64: 2>, scalar_prefetch = 0 : i64, scratch_operands = 0 : i64, tpu.core_type = #tpu.core_type<tc>, window_params = [{transform_indices = @transform_0, window_bounds = array<i64: 16, 128>}, {pipeline_mode = #tpu.pipeline_mode<synchronous>, transform_indices = @transform_1, window_bounds = array<i64: 16, 1, 1>}, {pipeline_mode = #tpu.pipeline_mode<synchronous>, transform_indices = @transform_2, window_bounds = array<i64: 16, 1, 1>}, {pipeline_mode = #tpu.pipeline_mode<synchronous>, transform_indices = @transform_3, window_bounds = array<i64: 16, 1, 1>}, {transform_indices = @transform_4, window_bounds = array<i64: 16, 16, 128>}]} {
    %c0 = arith.constant 0 : index
    %c0_0 = arith.constant 0 : index
    %0 = vector.load %arg1[%c0, %c0_0] : memref<16x128xf32, #tpu.memory_space<vmem>>, vector<16x128xf32>
    %c0_1 = arith.constant 0 : index
    %c0_2 = arith.constant 0 : index
    %c0_3 = arith.constant 0 : index
    %1 = vector.load %arg2[%c0_1, %c0_2, %c0_3] : memref<16x1x1xf32, #tpu.memory_space<vmem>>, vector<16x1x1xf32>
    %c0_4 = arith.constant 0 : index
    %c0_5 = arith.constant 0 : index
    %c0_6 = arith.constant 0 : index
    %2 = vector.load %arg3[%c0_4, %c0_5, %c0_6] : memref<16x1x1xf32, #tpu.memory_space<vmem>>, vector<16x1x1xf32>
    %c0_7 = arith.constant 0 : index
    %c0_8 = arith.constant 0 : index
    %c0_9 = arith.constant 0 : index
    %3 = vector.load %arg4[%c0_7, %c0_8, %c0_9] : memref<16x1x1xf32, #tpu.memory_space<vmem>>, vector<16x1x1xf32>
    %cst = arith.constant 0.000000e+00 : f32
    %4 = vector.broadcast %cst : f32 to vector<16x128xf32>
    %5 = arith.cmpf ogt, %0, %4 : vector<16x128xf32>
    %cst_10 = arith.constant 5.000000e+00 : f32
    %6 = vector.broadcast %cst_10 : f32 to vector<16x128xf32>
    %7 = arith.cmpf olt, %0, %6 : vector<16x128xf32>
    %8 = arith.andi %5, %7 : vector<16x128xi1>
    %cst_11 = arith.constant 2.500000e+00 : f32
    %9 = vector.broadcast %cst_11 : f32 to vector<16x128xf32>
    %10 = arith.select %8, %0, %9 : vector<16x128xi1>, vector<16x128xf32>
    %cst_12 = arith.constant 2.000000e-01 : f32
    %11 = vector.broadcast %cst_12 : f32 to vector<16x128xf32>
    %12 = arith.mulf %10, %11 : vector<16x128xf32>
    %13 = math.log %12 : vector<16x128xf32>
    %cst_13 = arith.constant 0.000000e+00 : f32
    %14 = vector.broadcast %cst_13 : f32 to vector<16x128xf32>
    %15 = arith.subf %14, %12 : vector<16x128xf32>
    %16 = math.log1p %15 : vector<16x128xf32>
    %17 = arith.mulf %10, %10 : vector<16x128xf32>
    %cst_14 = arith.constant 0.000000e+00 : f32
    %18 = vector.broadcast %cst_14 : f32 to vector<16x128xf32>
    %19 = arith.subf %18, %17 : vector<16x128xf32>
    %cst_15 = arith.constant 5.000000e+00 : f32
    %20 = vector.broadcast %cst_15 : f32 to vector<16x128xf32>
    %21 = arith.subf %20, %10 : vector<16x128xf32>
    %cst_16 = arith.constant 5.000000e+00 : f32
    %22 = vector.broadcast %cst_16 : f32 to vector<16x128xf32>
    %23 = arith.addf %22, %10 : vector<16x128xf32>
    %24 = arith.mulf %21, %23 : vector<16x128xf32>
    %25 = arith.divf %19, %24 : vector<16x128xf32>
    %cst_17 = arith.constant 0xFF800000 : f32
    %26 = vector.broadcast %cst_17 : f32 to vector<16x128xf32>
    %27 = arith.select %8, %25, %26 : vector<16x128xi1>, vector<16x128xf32>
    %28 = vector.shape_cast %13 : vector<16x128xf32> to vector<1x16x128xf32>
    %29 = vector.broadcast %2 : vector<16x1x1xf32> to vector<16x16x128xf32>
    %30 = vector.broadcast %28 : vector<1x16x128xf32> to vector<16x16x128xf32>
    %31 = arith.mulf %29, %30 : vector<16x16x128xf32>
    %32 = vector.broadcast %1 : vector<16x1x1xf32> to vector<16x16x128xf32>
    %33 = arith.addf %32, %31 : vector<16x16x128xf32>
    %34 = vector.shape_cast %16 : vector<16x128xf32> to vector<1x16x128xf32>
    %35 = vector.broadcast %3 : vector<16x1x1xf32> to vector<16x16x128xf32>
    %36 = vector.broadcast %34 : vector<1x16x128xf32> to vector<16x16x128xf32>
    %37 = arith.mulf %35, %36 : vector<16x16x128xf32>
    %38 = arith.addf %33, %37 : vector<16x16x128xf32>
    %39 = vector.shape_cast %27 : vector<16x128xf32> to vector<1x16x128xf32>
    %40 = vector.broadcast %39 : vector<1x16x128xf32> to vector<16x16x128xf32>
    %41 = arith.addf %38, %40 : vector<16x16x128xf32>
    %42 = math.exp %41 : vector<16x16x128xf32>
    %c0_18 = arith.constant 0 : index
    %c0_19 = arith.constant 0 : index
    %c0_20 = arith.constant 0 : index
    %43 = vector.load %arg5[%c0_18, %c0_19, %c0_20] : memref<16x16x128xf32, #tpu.memory_space<vmem>>, vector<16x16x128xf32>
    tpu.vector_store %arg5[%c0_18, %c0_19, %c0_20], %42 {strides = array<i32>} : memref<16x16x128xf32, #tpu.memory_space<vmem>>, vector<16x16x128xf32>,
    return
  }
  func.func @transform_0(%arg0: i32) -> (i32, i32) {
    %c0_i32 = arith.constant 0 : i32
    %c0_i32_0 = arith.constant 0 : i32
    return %arg0, %c0_i32 : i32, i32
  }
  func.func @transform_1(%arg0: i32) -> (i32, i32, i32) {
    %c0_i32 = arith.constant 0 : i32
    %c0_i32_0 = arith.constant 0 : i32
    %c0_i32_1 = arith.constant 0 : i32
    %c0_i32_2 = arith.constant 0 : i32
    return %c0_i32, %c0_i32_0, %c0_i32_1 : i32, i32, i32
  }
  func.func @transform_2(%arg0: i32) -> (i32, i32, i32) {
    %c0_i32 = arith.constant 0 : i32
    %c0_i32_0 = arith.constant 0 : i32
    %c0_i32_1 = arith.constant 0 : i32
    %c0_i32_2 = arith.constant 0 : i32
    return %c0_i32, %c0_i32_0, %c0_i32_1 : i32, i32, i32
  }
  func.func @transform_3(%arg0: i32) -> (i32, i32, i32) {
    %c0_i32 = arith.constant 0 : i32
    %c0_i32_0 = arith.constant 0 : i32
    %c0_i32_1 = arith.constant 0 : i32
    %c0_i32_2 = arith.constant 0 : i32
    return %c0_i32, %c0_i32_0, %c0_i32_1 : i32, i32, i32
  }
  func.func @transform_4(%arg0: i32) -> (i32, i32, i32) {
    %c0_i32 = arith.constant 0 : i32
    %c0_i32_0 = arith.constant 0 : i32
    %c0_i32_1 = arith.constant 0 : i32
    return %c0_i32, %arg0, %c0_i32_0 : i32, i32, i32
  }
}

</mosaic_0001>

<bundles_post_ra>
// kernel: tpu_custom_call.1
= control target key start
LH: loop header
LB: loop body
LE: loop exit
PB: predicated region body
PF: predicated region fallthrough
CT: control target
= control target key end

     0   :  { %9 = vsyncpa [#allocation3], 0  ;;  %s1878_s0 = inlined_call_operand.vmem [shape: f32[32,128], index: 0, kind: input, shape index: {}]   ;;  %s1879_s1 = inlined_call_operand.vmem [shape: f32[16,1,1], index: 1, kind: input, shape index: {}]   ;;  %s1880_s2 = inlined_call_operand.vmem [shape: f32[16,1,1], index: 2, kind: input, shape index: {}]   ;;  %s1881_s3 = inlined_call_operand.vmem [shape: f32[16,1,1], index: 3, kind: input, shape index: {}]   ;;  %s1882_s4 = inlined_call_operand.hbm [shape: f32[16,32,128], index: 4, kind: output, shape index: {}]  }
   0x1   :  { %11 = vsyncpa [#allocation3 + $0x1], 0  ;;  %s1353_s15 = smov 0   ;;  %s1355_s16 = smov 0  }
   0x2   :  { %s1357_s17 = smov 0   ;;  %s1359_s18 = smov 0  }
   0x3 LB: > { %s1374_s19 = sadd.s32 4294967295, %s1318_s18   ;;  %s1092_s20 = sadd.s32 4294967294, %s1318_s18   ;;  %s1318_s18 = sphi %s1359_s18, %s1892_s18   ;;  %s1314_s17 = sphi %s1357_s17, %s1891_s17   ;;  %s1310_s16 = sphi %s1355_s16, %s1890_s16   ;;  %s1306_s15 = sphi %s1353_s15, %s1889_s15  }
   0x4   : > { %s1378_s21 = sadd.s32 1, %s1318_s18   ;;  %s113_s22 = sadd.s32 1, %s1314_s17 }
   0x5   : > { %s110_s23 = ssub.s32 %s1318_s18, %s1378_s21  ;;  %p123_p0 = scmp.ne.s32.totalorder %s1314_s17, %s1310_s16 }
   0x6   : > { %p111_p1 = scmp.eq.s32.totalorder %s110_s23, 0  ;;  %p124_p2 = scmp.eq.s32.totalorder %s1374_s19, 1 }
   0x7   : > { %p129_p3 = scmp.ne.s32.totalorder %s1310_s16, %s1306_s15  ;;  %p130_p4 = scmp.eq.s32.totalorder %s1092_s20, 1 }
   0x8   : > { %s1389_s24 = scalar_select %p111_p1, %s1314_s17, %s113_s22  }
   0x9   : > { %p1391_p5 = por %p124_p2, %p123_p0  ;;  %p1395_p6 = por %p130_p4, %p129_p3 }
   0xa   : > { %p1095_p7 = scmp.ge.s32.totalorder %s1318_s18, 1  ;;  %p166_p8 = scmp.lt.s32.totalorder %s1318_s18, 3 }
   0xc   : > { %p167_p9 = pnand %p1095_p7, %p166_p8 }
   0xd   : > { %v1101_v0 = vld [vmem:[%s1880_s2 + $0x2] ss:$0 sm:$0xff] (!%p167_p9)  ;;  %v1099_v1 = vld [vmem:[%s1880_s2] ss:$0 sm:$0xff] (!%p167_p9)  ;;  %v1320_v2 = vmov (!%p167_p9), 0   ;;  %s189_s30 = sand.u32 (!%p167_p9), 1, %s1310_s16  }
   0xe   : > { %170 = sbr.rel (%p167_p9) target bundleno = 274 (0x112), region = 36  ;;  %1207 = vset.pattern.permute.xlu1 (!%p167_p9), %v1320_v2  ;;  %1206 = vset.pattern.permute.xlu0 (!%p167_p9), %v1320_v2  ;;  %v1102_v3 = vld [vmem:[%s1880_s2 + $0x3] ss:$0 sm:$0xff] (!%p167_p9)  ;;  %v1100_v4 = vld [vmem:[%s1880_s2 + $0x1] ss:$0 sm:$0xff] (!%p167_p9)  ;;  %s1097_s13 = sshll.u32 (!%p167_p9), %s1374_s19, 1 }
   0xf   : > { %388 = vperm.xlu1 (!%p167_p9), %1207, %v1101_v0   ;;  %380 = vperm.xlu0 (!%p167_p9), %1206, %v1099_v1   ;;  %v1104_v5 = vld [vmem:[%s1880_s2 + $0x5] ss:$0 sm:$0xff] (!%p167_p9)  ;;  %v1103_v6 = vld [vmem:[%s1880_s2 + $0x4] ss:$0 sm:$0xff] (!%p167_p9)  ;;  %v1106_v7 = vld [vmem:[%s1880_s2 + $0x7] ss:$0 sm:$0xff] (!%p167_p9) }
  0x10   : > { %v1105_v8 = vld [vmem:[%s1880_s2 + $0x6] ss:$0 sm:$0xff] (!%p167_p9)  ;;  %v1108_v9 = vld [vmem:[%s1880_s2 + $0x9] ss:$0 sm:$0xff] (!%p167_p9)  ;;  %v1107_v10 = vld [vmem:[%s1880_s2 + $0x8] ss:$0 sm:$0xff] (!%p167_p9) }
  0x11   : > { %v1110_v11 = vld [vmem:[%s1880_s2 + $0xb] ss:$0 sm:$0xff] (!%p167_p9)  ;;  %v1109_v12 = vld [vmem:[%s1880_s2 + $0xa] ss:$0 sm:$0xff] (!%p167_p9)  ;;  %v1112_v13 = vld [vmem:[%s1880_s2 + $0xd] ss:$0 sm:$0xff] (!%p167_p9) }
  0x12   : > { %v1111_v14 = vld [vmem:[%s1880_s2 + $0xc] ss:$0 sm:$0xff] (!%p167_p9)  ;;  %v1114_v15 = vld [vmem:[%s1880_s2 + $0xf] ss:$0 sm:$0xff] (!%p167_p9)  ;;  %v1113_v16 = vld [vmem:[%s1880_s2 + $0xe] ss:$0 sm:$0xff] (!%p167_p9) }
  0x13   : > { %392 = vperm.xlu1 (!%p167_p9), %1207, %v1102_v3   ;;  %384 = vperm.xlu0 (!%p167_p9), %1206, %v1100_v4   ;;  %v1116_v17 = vld [vmem:[%s1879_s1 + $0x1] ss:$0 sm:$0xff] (!%p167_p9)  ;;  %v1115_v18 = vld [vmem:[%s1879_s1] ss:$0 sm:$0xff] (!%p167_p9)  ;;  %v1118_v19 = vld [vmem:[%s1879_s1 + $0x3] ss:$0 sm:$0xff] (!%p167_p9) }
  0x14   : > { %v1117_v20 = vld [vmem:[%s1879_s1 + $0x2] ss:$0 sm:$0xff] (!%p167_p9)  ;;  %v1120_v21 = vld [vmem:[%s1879_s1 + $0x5] ss:$0 sm:$0xff] (!%p167_p9)  ;;  %v1119_v22 = vld [vmem:[%s1879_s1 + $0x4] ss:$0 sm:$0xff] (!%p167_p9) }
  0x15   : > { %v1122_v23 = vld [vmem:[%s1879_s1 + $0x7] ss:$0 sm:$0xff]  ;;  %v1121_v24 = vld [vmem:[%s1879_s1 + $0x6] ss:$0 sm:$0xff]  ;;  %v1124_v25 = vld [vmem:[%s1879_s1 + $0x9] ss:$0 sm:$0xff] }
  0x16   : > { %v1123_v26 = vld [vmem:[%s1879_s1 + $0x8] ss:$0 sm:$0xff]  ;;  %v1126_v27 = vld [vmem:[%s1879_s1 + $0xb] ss:$0 sm:$0xff]  ;;  %v1125_v28 = vld [vmem:[%s1879_s1 + $0xa] ss:$0 sm:$0xff] }
  0x17   : > { %400 = vperm.xlu1 %1207, %v1104_v5   ;;  %396 = vperm.xlu0 %1206, %v1103_v6   ;;  %v1128_v29 = vld [vmem:[%s1879_s1 + $0xd] ss:$0 sm:$0xff]  ;;  %v1127_v30 = vld [vmem:[%s1879_s1 + $0xc] ss:$0 sm:$0xff]  ;;  %v1130_v31 = vld [vmem:[%s1879_s1 + $0xf] ss:$0 sm:$0xff] }
  0x18   : > { %v1129_v32 = vld [vmem:[%s1879_s1 + $0xe] ss:$0 sm:$0xff]  ;;  %v1132_v33 = vld [vmem:[%s1881_s3 + $0x1] ss:$0 sm:$0xff]  ;;  %v1131_v34 = vld [vmem:[%s1881_s3] ss:$0 sm:$0xff] }
  0x19   : > { %v1134_v35 = vld [vmem:[%s1881_s3 + $0x3] ss:$0 sm:$0xff]  ;;  %v1133_v36 = vld [vmem:[%s1881_s3 + $0x2] ss:$0 sm:$0xff]  ;;  %v1136_v37 = vld [vmem:[%s1881_s3 + $0x5] ss:$0 sm:$0xff] }
  0x1a   : > { %v1135_v38 = vld [vmem:[%s1881_s3 + $0x4] ss:$0 sm:$0xff]  ;;  %v1138_v39 = vld [vmem:[%s1881_s3 + $0x7] ss:$0 sm:$0xff]  ;;  %v1137_v40 = vld [vmem:[%s1881_s3 + $0x6] ss:$0 sm:$0xff] }
  0x1b   : > { %408 = vperm.xlu1 %1207, %v1106_v7   ;;  %404 = vperm.xlu0 %1206, %v1105_v8   ;;  %v1140_v41 = vld [vmem:[%s1881_s3 + $0x9] ss:$0 sm:$0xff]  ;;  %v1139_v42 = vld [vmem:[%s1881_s3 + $0x8] ss:$0 sm:$0xff]  ;;  %v1142_v43 = vld [vmem:[%s1881_s3 + $0xb] ss:$0 sm:$0xff] }
  0x1c   : > { %v1141_v44 = vld [vmem:[%s1881_s3 + $0xa] ss:$0 sm:$0xff]  ;;  %v1144_v45 = vld [vmem:[%s1881_s3 + $0xd] ss:$0 sm:$0xff]  ;;  %v1143_v46 = vld [vmem:[%s1881_s3 + $0xc] ss:$0 sm:$0xff] }
  0x1d   : > { %v1146_v47 = vld [vmem:[%s1881_s3 + $0xf] ss:$0 sm:$0xff]  ;;  %v1145_v48 = vld [vmem:[%s1881_s3 + $0xe] ss:$0 sm:$0xff]  ;;  %p193_p10 = scmp.lt.s32.totalorder %s1097_s13, 3  ;;  %s1096_s27 = sshll.u32 %s189_s30, 8 }
  0x1e   : > { %s1755_s28 = scalar_lea.vmem [#allocation2], %s1096_s27  ;;  %s988_s29 = scalar_lea.sflag [#allocation3], %s189_s30 }
  0x1f   : > { %416 = vperm.xlu1 %1207, %v1108_v9   ;;  %412 = vperm.xlu0 %1206, %v1107_v10   ;;  %s1894_s13 = smov (!%p193_p10, %s1097_s13), 3 }
  0x20   : > { %s1098_s14 = sshll.u32 %s1894_s13, 3 }
  0x21   : > { %s196_s23 = scalar_lea.vmem %s1878_s0, %s1098_s14 }
  0x22   : > { %v199_v55 = vld [vmem:[%s196_s23] sm:$0xff]  ;;  %v200_v56 = vld [vmem:[%s196_s23 + $0x8] sm:$0xff] }
  0x23   : > { %424 = vperm.xlu1 %1207, %v1110_v11   ;;  %420 = vperm.xlu0 %1206, %v1109_v12   ;;  %vm249_vm0 = vcmp.gt.f32.partialorder %v199_v55, 0.0  ;;  %vm251_vm1 = vcmp.lt.f32.partialorder %v199_v55, 5.0  ;;  %vm250_vm2 = vcmp.gt.f32.partialorder %v200_v56, 0.0  ;;  %vm252_vm3 = vcmp.lt.f32.partialorder %v200_v56, 5.0 }
  0x24   : > { %vm1566_vm4 = vmand %vm249_vm0, %vm251_vm1 }
  0x25   : > { %vm1570_vm5 = vmand %vm250_vm2, %vm252_vm3  ;;  %v255_v63 = vsel %vm1566_vm4, %v199_v55, 2.5 }
  0x26   : > { %v256_v0 = vsel %vm1570_vm5, %v200_v56, 2.5  ;;  %v257_v3 = vmul.f32 0.2, %v255_v63  ;;  %v287_v9 = vsub.f32 5.0, %v255_v63  ;;  %v289_v10 = vadd.f32 5.0, %v255_v63 }
  0x27   : > { %432 = vperm.xlu1 %1207, %v1112_v13   ;;  %428 = vperm.xlu0 %1206, %v1111_v14   ;;  %v258_v4 = vmul.f32 0.2, %v256_v0  ;;  %v288_v11 = vsub.f32 5.0, %v256_v0  ;;  %v290_v12 = vadd.f32 5.0, %v256_v0 }
  0x28   : > { %v263_v5 = vsub.f32 0.0, %v257_v3  ;;  %1208 = vlog2.f32 %v257_v3 }
  0x29   : > { %v264_v8 = vsub.f32 0.0, %v258_v4  ;;  %1210 = vlog2.f32 %v258_v4 }
  0x2a   : > { %v265_v13 = vadd.f32 1.0, %v263_v5 }
  0x2b   : > { %440 = vperm.xlu1 %1207, %v1114_v15   ;;  %436 = vperm.xlu0 %1206, %v1113_v16   ;;  %v274_v16 = vadd.f32 1.0, %v264_v8 }
  0x2c   : > { %1212 = vlog2.f32 %v265_v13 }
  0x2d   : > { %1214 = vlog2.f32 %v274_v16 }
  0x2f   : > { %560 = vperm.xlu1 %1207, %v1116_v17   ;;  %556 = vperm.xlu0 %1206, %v1115_v18   ;;  %v291_v17 = vmul.f32 %v289_v10, %v287_v9  ;;  %v292_v18 = vmul.f32 %v290_v12, %v288_v11 }
  0x31   : > { %1216 = vrcp.f32 %v291_v17 }
  0x32   : > { %1218 = vrcp.f32 %v292_v18 }
  0x33   : > { %568 = vperm.xlu1 %1207, %v1118_v19   ;;  %564 = vperm.xlu0 %1206, %v1117_v20  }
  0x37   : > { %576 = vperm.xlu1 %1207, %v1120_v21   ;;  %572 = vperm.xlu0 %1206, %v1119_v22  }
  0x3b   : > { %584 = vperm.xlu1 %1207, %v1122_v23   ;;  %580 = vperm.xlu0 %1206, %v1121_v24   ;;  %v268_v23 = vmul.f32 -0.5, %v263_v5  ;;  %v277_v24 = vmul.f32 -0.5, %v264_v8 }
  0x3f   : > { %592 = vperm.xlu1 %1207, %v1124_v25   ;;  %588 = vperm.xlu0 %1206, %v1123_v26   ;;  %v1209_v25 = vpop.eup %1208  ;;  %v283_v26 = vmul.f32 %v255_v63, %v255_v63 }
  0x43   : > { %600 = vperm.xlu1 %1207, %v1126_v27   ;;  %596 = vperm.xlu0 %1206, %v1125_v28   ;;  %v284_v27 = vmul.f32 %v256_v0, %v256_v0  ;;  %v1211_v28 = vpop.eup %1210 }
  0x47   : > { %608 = vperm.xlu1 %1207, %v1128_v29   ;;  %604 = vperm.xlu0 %1206, %v1127_v30  }
  0x4b   : > { %616 = vperm.xlu1 %1207, %v1130_v31   ;;  %612 = vperm.xlu0 %1206, %v1129_v32   ;;  %v1213_v31 = vpop.eup %1212 }
  0x4c   : > { %v1215_v32 = vpop.eup %1214 }
  0x4f   : > { %736 = vperm.xlu1 %1207, %v1132_v33   ;;  %732 = vperm.xlu0 %1206, %v1131_v34   ;;  %v269_v33 = vadd.f32 1.0, %v268_v23  ;;  %v278_v34 = vadd.f32 1.0, %v277_v24 }
  0x53   : > { %744 = vperm.xlu1 %1207, %v1134_v35   ;;  %740 = vperm.xlu0 %1206, %v1133_v36   ;;  %v1217_v35 = vpop.eup %1216  ;;  %v271_v36 = vand.u32 2147483647, %v263_v5 }
  0x55   : > { %vm272_vm6 = vcmp.lt.f32.partialorder %v271_v36, 0.0004427343 }
  0x57   : > { %752 = vperm.xlu1 %1207, %v1136_v37   ;;  %748 = vperm.xlu0 %1206, %v1135_v38   ;;  %v280_v37 = vand.u32 2147483647, %v264_v8  ;;  %v285_v38 = vsub.f32 0.0, %v283_v26 }
  0x59   : > { %vm281_vm7 = vcmp.lt.f32.partialorder %v280_v37, 0.0004427343  ;;  %v294_v55 = vmul.f32 %v1217_v35, %v285_v38 }
  0x5b   : > { %760 = vperm.xlu1 %1207, %v1138_v39   ;;  %756 = vperm.xlu0 %1206, %v1137_v40   ;;  %v286_v39 = vsub.f32 0.0, %v284_v27  ;;  %v1219_v40 = vpop.eup %1218  ;;  %v1618_v11 = vsel %vm1566_vm4, %v294_v55, -inf }
  0x5d   : > { %v296_v56 = vmul.f32 %v1219_v40, %v286_v39 }
  0x5f   : > { %768 = vperm.xlu1 %1207, %v1140_v41   ;;  %764 = vperm.xlu0 %1206, %v1139_v42  }
  0x63   : > { %776 = vperm.xlu1 %1207, %v1142_v43   ;;  %772 = vperm.xlu0 %1206, %v1141_v44   ;;  %v260_v43 = vmul.f32 0.6931472, %v1209_v25  ;;  %v262_v44 = vmul.f32 0.6931472, %v1211_v28 }
  0x67   : > { %784 = vperm.xlu1 %1207, %v1144_v45   ;;  %780 = vperm.xlu0 %1206, %v1143_v46   ;;  %v267_v45 = vmul.f32 0.6931472, %v1213_v31  ;;  %v270_v46 = vmul.f32 %v269_v33, %v263_v5  ;;  %v1622_v5 = vsel %vm1570_vm5, %v296_v56, -inf }
  0x69   : > { %v1610_v3 = vsel %vm272_vm6, %v270_v46, %v267_v45 }
  0x6b   : > { %792 = vperm.xlu1 %1207, %v1146_v47   ;;  %788 = vperm.xlu0 %1206, %v1145_v48   ;;  %v276_v47 = vmul.f32 0.6931472, %v1215_v32  ;;  %v279_v48 = vmul.f32 %v278_v34, %v264_v8 }
  0x6d   : > { %v1612_v4 = vsel %vm281_vm7, %v279_v48, %v276_v47 }
  0x8e   : > { %v1547_v49 = vpop.permute.xlu1 %388  ;;  %v1549_v50 = vpop.permute.xlu0 %380 }
  0x8f   : > { %v447_v9 = vmul.f32 %v1547_v49, %v260_v43  ;;  %v448_v10 = vmul.f32 %v1547_v49, %v262_v44  ;;  %v443_v8 = vmul.f32 %v1549_v50, %v260_v43  ;;  %v444_v12 = vmul.f32 %v1549_v50, %v262_v44 }
  0x92   : > { %v1551_v51 = vpop.permute.xlu1 %392  ;;  %v1553_v52 = vpop.permute.xlu0 %384 }
  0x93   : > { %v449_v13 = vmul.f32 %v1551_v51, %v260_v43  ;;  %v450_v16 = vmul.f32 %v1551_v51, %v262_v44  ;;  %v445_v49 = vmul.f32 %v1553_v52, %v260_v43  ;;  %v446_v59 = vmul.f32 %v1553_v52, %v262_v44 }
  0x96   : > { %v1558_v53 = vpop.permute.xlu1 %400  ;;  %v1560_v54 = vpop.permute.xlu0 %396 }
  0x97   : > { %v453_v23 = vmul.f32 %v1558_v53, %v260_v43  ;;  %v454_v60 = vmul.f32 %v1558_v53, %v262_v44  ;;  %v451_v24 = vmul.f32 %v1560_v54, %v260_v43  ;;  %v452_v25 = vmul.f32 %v1560_v54, %v262_v44 }
  0x9a   : > { %v1562_v57 = vpop.permute.xlu1 %408  ;;  %v1564_v58 = vpop.permute.xlu0 %404 }
  0x9b   : > { %v457_v50 = vmul.f32 %v1562_v57, %v260_v43  ;;  %v458_v26 = vmul.f32 %v1562_v57, %v262_v44  ;;  %v455_v51 = vmul.f32 %v1564_v58, %v260_v43  ;;  %v456_v27 = vmul.f32 %v1564_v58, %v262_v44 }
  0x9e   : > { %v1574_v61 = vpop.permute.xlu1 %416  ;;  %v1576_v62 = vpop.permute.xlu0 %412 }
  0x9f   : > { %v461_v28 = vmul.f32 %v1574_v61, %v260_v43  ;;  %v462_v52 = vmul.f32 %v1574_v61, %v262_v44  ;;  %v459_v31 = vmul.f32 %v1576_v62, %v260_v43  ;;  %v460_v53 = vmul.f32 %v1576_v62, %v262_v44 }
  0xa2   : > { %v1582_v1 = vpop.permute.xlu1 %424  ;;  %v1584_v2 = vpop.permute.xlu0 %420 }
  0xa3   : > { %v465_v32 = vmul.f32 %v1582_v1, %v260_v43  ;;  %v466_v54 = vmul.f32 %v1582_v1, %v262_v44  ;;  %v463_v57 = vmul.f32 %v1584_v2, %v260_v43  ;;  %v464_v35 = vmul.f32 %v1584_v2, %v262_v44 }
  0xa6   : > { %v1586_v6 = vpop.permute.xlu1 %432  ;;  %v1588_v7 = vpop.permute.xlu0 %428 }
  0xa7   : > { %v469_v58 = vmul.f32 %v1586_v6, %v260_v43  ;;  %v470_v36 = vmul.f32 %v1586_v6, %v262_v44  ;;  %v467_v61 = vmul.f32 %v1588_v7, %v260_v43  ;;  %v468_v37 = vmul.f32 %v1588_v7, %v262_v44 }
  0xaa   : > { %v1590_v14 = vpop.permute.xlu1 %440  ;;  %v1592_v15 = vpop.permute.xlu0 %436 }
  0xab   : > { %v473_v62 = vmul.f32 %v1590_v14, %v260_v43  ;;  %v474_v38 = vmul.f32 %v1590_v14, %v262_v44  ;;  %v471_v1 = vmul.f32 %v1592_v15, %v260_v43  ;;  %v1654_v39 = vmul.f32 %v1592_v15, %v262_v44 }
  0xae   : > { %v1594_v19 = vpop.permute.xlu1 %560  ;;  %v1596_v20 = vpop.permute.xlu0 %556 }
  0xaf   : > { %v621_v40 = vadd.f32 %v1594_v19, %v445_v49  ;;  %v622_v2 = vadd.f32 %v1594_v19, %v446_v59  ;;  %v619_v45 = vadd.f32 %v1596_v20, %v443_v8  ;;  %v620_v6 = vadd.f32 %v1596_v20, %v444_v12 }
  0xb2   : > { %v1598_v21 = vpop.permute.xlu1 %568  ;;  %v1600_v22 = vpop.permute.xlu0 %564 }
  0xb3   : > { %v625_v46 = vadd.f32 %v1598_v21, %v449_v13  ;;  %v626_v7 = vadd.f32 %v1598_v21, %v450_v16  ;;  %v623_v14 = vadd.f32 %v1600_v22, %v447_v9  ;;  %v624_v15 = vadd.f32 %v1600_v22, %v448_v10 }
  0xb6   : > { %v1602_v29 = vpop.permute.xlu1 %576  ;;  %v1604_v30 = vpop.permute.xlu0 %572 }
  0xb7   : > { %v629_v43 = vadd.f32 %v1602_v29, %v453_v23  ;;  %v630_v44 = vadd.f32 %v1602_v29, %v454_v60  ;;  %v1669_v19 = vadd.f32 %v1604_v30, %v451_v24  ;;  %v1672_v20 = vadd.f32 %v1604_v30, %v452_v25 }
  0xba   : > { %v1606_v41 = vpop.permute.xlu1 %584  ;;  %v1608_v42 = vpop.permute.xlu0 %580 }
  0xbb   : > { %v1675_v55 = vadd.f32 %v1606_v41, %v457_v50  ;;  %v1678_v21 = vadd.f32 %v1606_v41, %v458_v26  ;;  %v1681_v56 = vadd.f32 %v1608_v42, %v455_v51  ;;  %v1684_v22 = vadd.f32 %v1608_v42, %v456_v27 }
  0xbe   : > { %v593_v63 = vpop.permute.xlu1 %592  ;;  %v589_v0 = vpop.permute.xlu0 %588 }
  0xbf   : > { %v1686_v9 = vadd.f32 %v593_v63, %v461_v28  ;;  %v1688_v29 = vadd.f32 %v593_v63, %v462_v52  ;;  %v1690_v10 = vadd.f32 %v589_v0, %v459_v31  ;;  %v1692_v30 = vadd.f32 %v589_v0, %v460_v53 }
  0xc2   : > { %v601_v17 = vpop.permute.xlu1 %600  ;;  %v597_v18 = vpop.permute.xlu0 %596 }
  0xc3   : > { %v1694_v8 = vadd.f32 %v601_v17, %v465_v32  ;;  %v1696_v12 = vadd.f32 %v601_v17, %v466_v54  ;;  %v1702_v63 = vadd.f32 %v597_v18, %v463_v57  ;;  %v1704_v23 = vadd.f32 %v597_v18, %v464_v35 }
  0xc6   : > { %v609_v33 = vpop.permute.xlu1 %608  ;;  %v605_v34 = vpop.permute.xlu0 %604 }
  0xc7   : > { %v1706_v0 = vadd.f32 %v609_v33, %v469_v58  ;;  %v1708_v60 = vadd.f32 %v609_v33, %v470_v36  ;;  %v1710_v26 = vadd.f32 %v605_v34, %v467_v61  ;;  %v1712_v51 = vadd.f32 %v605_v34, %v468_v37 }
  0xca   : > { %v617_v47 = vpop.permute.xlu1 %616  ;;  %v1662_v48 = vpop.permute.xlu0 %612 }
  0xcb   : > { %v1714_v27 = vadd.f32 %v617_v47, %v473_v62  ;;  %v1716_v28 = vadd.f32 %v617_v47, %v474_v38  ;;  %v1727_v58 = vadd.f32 %v1662_v48, %v471_v1 }
  0xce   : > { %v737_v41 = vpop.permute.xlu1 %736  ;;  %v733_v13 = vpop.permute.xlu0 %732 }
  0xcf   : > { %v797_v16 = vmul.f32 %v737_v41, %v1610_v3  ;;  %v798_v49 = vmul.f32 %v737_v41, %v1612_v4  ;;  %v795_v42 = vmul.f32 %v733_v13, %v1610_v3  ;;  %v796_v59 = vmul.f32 %v733_v13, %v1612_v4 }
  0xd1   : > { %v829_v17 = vadd.f32 %v797_v16, %v621_v40  ;;  %v830_v24 = vadd.f32 %v798_v49, %v622_v2  ;;  %v827_v25 = vadd.f32 %v795_v42, %v619_v45  ;;  %v828_v50 = vadd.f32 %v796_v59, %v620_v6 }
  0xd2   : > { %v745_v52 = vpop.permute.xlu1 %744  ;;  %v741_v31 = vpop.permute.xlu0 %740 }
  0xd3   : > { %v861_v18 = vadd.f32 %v829_v17, %v1618_v11  ;;  %v862_v53 = vadd.f32 %v830_v24, %v1622_v5  ;;  %v859_v32 = vadd.f32 %v827_v25, %v1618_v11  ;;  %v860_v54 = vadd.f32 %v828_v50, %v1622_v5 }
  0xd4   : > { %v801_v33 = vmul.f32 %v745_v52, %v1610_v3  ;;  %v802_v57 = vmul.f32 %v745_v52, %v1612_v4  ;;  %v799_v34 = vmul.f32 %v741_v31, %v1610_v3  ;;  %v800_v35 = vmul.f32 %v741_v31, %v1612_v4 }
  0xd5   : > { %v895_v36 = vmul.f32 1.442695, %v861_v18  ;;  %v897_v61 = vmul.f32 1.442695, %v862_v53  ;;  %v891_v37 = vmul.f32 1.442695, %v859_v32 }
  0xd6   : > { %v893_v62 = vmul.f32 1.442695, %v860_v54  ;;  %v833_v38 = vadd.f32 %v801_v33, %v625_v46  ;;  %v834_v40 = vadd.f32 %v802_v57, %v626_v7  ;;  %v831_v2 = vadd.f32 %v799_v34, %v623_v14  ;;  %v753_v45 = vpop.permute.xlu1 %752  ;;  %v749_v6 = vpop.permute.xlu0 %748 }
  0xd7   : > { %1220 = vpow2.f32 %v895_v36  ;;  %v832_v47 = vadd.f32 %v800_v35, %v624_v15  ;;  %v805_v41 = vmul.f32 %v753_v45, %v1610_v3  ;;  %v806_v13 = vmul.f32 %v753_v45, %v1612_v4 }
  0xd8   : > { %1222 = vpow2.f32 %v897_v61  ;;  %v865_v16 = vadd.f32 %v833_v38, %v1618_v11  ;;  %v866_v1 = vadd.f32 %v834_v40, %v1622_v5  ;;  %v863_v49 = vadd.f32 %v831_v2, %v1618_v11 }
  0xd9   : > { %1224 = vpow2.f32 %v891_v37  ;;  %v864_v46 = vadd.f32 %v832_v47, %v1622_v5  ;;  %v837_v7 = vadd.f32 %v805_v41, %v629_v43  ;;  %v838_v14 = vadd.f32 %v806_v13, %v630_v44 }
  0xda   : > { %1226 = vpow2.f32 %v893_v62  ;;  %v903_v42 = vmul.f32 1.442695, %v865_v16  ;;  %v905_v15 = vmul.f32 1.442695, %v866_v1  ;;  %v899_v59 = vmul.f32 1.442695, %v863_v49  ;;  %v761_v17 = vpop.permute.xlu1 %760  ;;  %v757_v24 = vpop.permute.xlu0 %756 }
  0xdb   : > { %v901_v25 = vmul.f32 1.442695, %v864_v46  ;;  %v869_v50 = vadd.f32 %v837_v7, %v1618_v11  ;;  %v870_v52 = vadd.f32 %v838_v14, %v1622_v5  ;;  %v803_v31 = vmul.f32 %v749_v6, %v1610_v3 }
  0xdc   : > { %1228 = vpow2.f32 %v903_v42  ;;  %v804_v18 = vmul.f32 %v749_v6, %v1612_v4  ;;  %v809_v43 = vmul.f32 %v761_v17, %v1610_v3  ;;  %v810_v44 = vmul.f32 %v761_v17, %v1612_v4 }
  0xdd   : > { %1230 = vpow2.f32 %v905_v15  ;;  %v911_v53 = vmul.f32 1.442695, %v869_v50  ;;  %v913_v32 = vmul.f32 1.442695, %v870_v52  ;;  %v835_v54 = vadd.f32 %v803_v31, %v1669_v19 }
  0xde   : > { %1232 = vpow2.f32 %v899_v59  ;;  %v836_v33 = vadd.f32 %v804_v18, %v1672_v20  ;;  %v841_v57 = vadd.f32 %v809_v43, %v1675_v55  ;;  %v842_v34 = vadd.f32 %v810_v44, %v1678_v21  ;;  %v769_v35 = vpop.permute.xlu1 %768  ;;  %v765_v36 = vpop.permute.xlu0 %764 }
  0xdf   : > { %1234 = vpow2.f32 %v901_v25  ;;  %v867_v61 = vadd.f32 %v835_v54, %v1618_v11  ;;  %v807_v37 = vmul.f32 %v757_v24, %v1610_v3  ;;  %v808_v62 = vmul.f32 %v757_v24, %v1612_v4 }
  0xe0   : > { %1236 = vpow2.f32 %v911_v53  ;;  %v868_v38 = vadd.f32 %v836_v33, %v1622_v5  ;;  %v873_v19 = vadd.f32 %v841_v57, %v1618_v11  ;;  %v874_v20 = vadd.f32 %v842_v34, %v1622_v5 }
  0xe1   : > { %v1221_v40 = vpop.eup %1220  ;;  %1238 = vpow2.f32 %v913_v32  ;;  %v907_v55 = vmul.f32 1.442695, %v867_v61  ;;  %v839_v21 = vadd.f32 %v807_v37, %v1681_v56  ;;  %v840_v2 = vadd.f32 %v808_v62, %v1684_v22 }
  0xe2   : > { %v1223_v45 = vpop.eup %1222  ;;  %957 = vst [vmem:[%s1755_s28 + $0x10] sm:$0xff] %v1221_v40  ;;  %v909_v6 = vmul.f32 1.442695, %v868_v38  ;;  %v919_v47 = vmul.f32 1.442695, %v873_v19  ;;  %v813_v13 = vmul.f32 %v769_v35, %v1610_v3  ;;  %v777_v16 = vpop.permute.xlu1 %776  ;;  %v814_v49 = vmul.f32 %v769_v35, %v1612_v4 }
  0xe3   : > { %v921_v41 = vmul.f32 1.442695, %v874_v20  ;;  %v1225_v1 = vpop.eup %1224  ;;  %958 = vst [vmem:[%s1755_s28 + $0x18] sm:$0xff] %v1223_v45  ;;  %1240 = vpow2.f32 %v907_v55  ;;  %v871_v56 = vadd.f32 %v839_v21, %v1618_v11  ;;  %v872_v22 = vadd.f32 %v840_v2, %v1622_v5  ;;  %v773_v15 = vpop.permute.xlu0 %772 }
  0xe4   : > { %v1227_v46 = vpop.eup %1226  ;;  %955 = vst [vmem:[%s1755_s28] sm:$0xff] %v1225_v1  ;;  %1242 = vpow2.f32 %v909_v6  ;;  %v845_v7 = vadd.f32 %v813_v13, %v1686_v9  ;;  %v811_v14 = vmul.f32 %v765_v36, %v1610_v3  ;;  %v812_v42 = vmul.f32 %v765_v36, %v1612_v4 }
  0xe5   : > { %956 = vst [vmem:[%s1755_s28 + $0x8] sm:$0xff] %v1227_v46  ;;  %1244 = vpow2.f32 %v919_v47  ;;  %v915_v59 = vmul.f32 1.442695, %v871_v56  ;;  %v917_v17 = vmul.f32 1.442695, %v872_v22  ;;  %v846_v24 = vadd.f32 %v814_v49, %v1688_v29 }
  0xe6   : > { %v1229_v25 = vpop.eup %1228  ;;  %1246 = vpow2.f32 %v921_v41  ;;  %v877_v50 = vadd.f32 %v845_v7, %v1618_v11  ;;  %v843_v52 = vadd.f32 %v811_v14, %v1690_v10  ;;  %v844_v9 = vadd.f32 %v812_v42, %v1692_v30  ;;  %v785_v31 = vpop.permute.xlu1 %784 }
  0xe7   : > { %v1231_v18 = vpop.eup %1230  ;;  %961 = vst [vmem:[%s1755_s28 + $0x30] sm:$0xff] %v1229_v25  ;;  %1248 = vpow2.f32 %v915_v59  ;;  %v878_v43 = vadd.f32 %v846_v24, %v1622_v5  ;;  %v817_v44 = vmul.f32 %v777_v16, %v1610_v3  ;;  %v818_v29 = vmul.f32 %v777_v16, %v1612_v4  ;;  %v781_v38 = vpop.permute.xlu0 %780 }
  0xe8   : > { %v1233_v53 = vpop.eup %1232  ;;  %962 = vst [vmem:[%s1755_s28 + $0x38] sm:$0xff] %v1231_v18  ;;  %1250 = vpow2.f32 %v917_v17  ;;  %v927_v32 = vmul.f32 1.442695, %v877_v50  ;;  %v875_v10 = vadd.f32 %v843_v52, %v1618_v11  ;;  %v876_v30 = vadd.f32 %v844_v9, %v1622_v5 }
  0xe9   : > { %v1235_v54 = vpop.eup %1234  ;;  %959 = vst [vmem:[%s1755_s28 + $0x20] sm:$0xff] %v1233_v53  ;;  %v929_v33 = vmul.f32 1.442695, %v878_v43  ;;  %v849_v57 = vadd.f32 %v817_v44, %v1694_v8  ;;  %v850_v34 = vadd.f32 %v818_v29, %v1696_v12  ;;  %v815_v35 = vmul.f32 %v773_v15, %v1610_v3 }
  0xea   : > { %v1237_v36 = vpop.eup %1236  ;;  %960 = vst [vmem:[%s1755_s28 + $0x28] sm:$0xff] %v1235_v54  ;;  %1252 = vpow2.f32 %v927_v32  ;;  %v923_v61 = vmul.f32 1.442695, %v875_v10  ;;  %v925_v37 = vmul.f32 1.442695, %v876_v30  ;;  %v816_v62 = vmul.f32 %v773_v15, %v1612_v4  ;;  %v793_v2 = vpop.permute.xlu1 %792 }
  0xeb   : > { %v1239_v19 = vpop.eup %1238  ;;  %965 = vst [vmem:[%s1755_s28 + $0x50] sm:$0xff] %v1237_v36  ;;  %1254 = vpow2.f32 %v929_v33  ;;  %v881_v20 = vadd.f32 %v849_v57, %v1618_v11  ;;  %v882_v8 = vadd.f32 %v850_v34, %v1622_v5  ;;  %v847_v12 = vadd.f32 %v815_v35, %v1702_v63  ;;  %v789_v42 = vpop.permute.xlu0 %788 }
  0xec   : > { %966 = vst [vmem:[%s1755_s28 + $0x58] sm:$0xff] %v1239_v19  ;;  %1256 = vpow2.f32 %v923_v61  ;;  %v848_v40 = vadd.f32 %v816_v62, %v1704_v23  ;;  %v821_v55 = vmul.f32 %v785_v31, %v1610_v3  ;;  %v822_v21 = vmul.f32 %v785_v31, %v1612_v4 }
  0xed   : > { %v1241_v45 = vpop.eup %1240  ;;  %1258 = vpow2.f32 %v925_v37  ;;  %v935_v6 = vmul.f32 1.442695, %v881_v20  ;;  %v937_v47 = vmul.f32 1.442695, %v882_v8  ;;  %v879_v41 = vadd.f32 %v847_v12, %v1618_v11 }
  0xee   : > { %v1243_v13 = vpop.eup %1242  ;;  %963 = vst [vmem:[%s1755_s28 + $0x40] sm:$0xff] %v1241_v45  ;;  %v880_v63 = vadd.f32 %v848_v40, %v1622_v5  ;;  %v853_v16 = vadd.f32 %v821_v55, %v1706_v0  ;;  %v854_v23 = vadd.f32 %v822_v21, %v1708_v60  ;;  %v819_v1 = vmul.f32 %v781_v38, %v1610_v3 }
  0xef   : > { %v1245_v56 = vpop.eup %1244  ;;  %964 = vst [vmem:[%s1755_s28 + $0x48] sm:$0xff] %v1243_v13  ;;  %1260 = vpow2.f32 %v935_v6  ;;  %v931_v22 = vmul.f32 1.442695, %v879_v41  ;;  %v820_v49 = vmul.f32 %v781_v38, %v1612_v4  ;;  %v825_v46 = vmul.f32 %v793_v2, %v1610_v3 }
  0xf0   : > { %v1247_v7 = vpop.eup %1246  ;;  %969 = vst [vmem:[%s1755_s28 + $0x70] sm:$0xff] %v1245_v56  ;;  %1262 = vpow2.f32 %v937_v47  ;;  %v933_v14 = vmul.f32 1.442695, %v880_v63  ;;  %v885_v0 = vadd.f32 %v853_v16, %v1618_v11  ;;  %v886_v60 = vadd.f32 %v854_v23, %v1622_v5 }
  0xf1   : > { %v1249_v15 = vpop.eup %1248  ;;  %970 = vst [vmem:[%s1755_s28 + $0x78] sm:$0xff] %v1247_v7  ;;  %1264 = vpow2.f32 %v931_v22  ;;  %v851_v59 = vadd.f32 %v819_v1, %v1710_v26  ;;  %v852_v17 = vadd.f32 %v820_v49, %v1712_v51  ;;  %v826_v24 = vmul.f32 %v793_v2, %v1612_v4 }
  0xf2   : > { %v1251_v25 = vpop.eup %1250  ;;  %967 = vst [vmem:[%s1755_s28 + $0x60] sm:$0xff] %v1249_v15  ;;  %1266 = vpow2.f32 %v933_v14  ;;  %v943_v50 = vmul.f32 1.442695, %v885_v0  ;;  %v945_v52 = vmul.f32 1.442695, %v886_v60  ;;  %v857_v9 = vadd.f32 %v825_v46, %v1714_v27 }
  0xf3   : > { %968 = vst [vmem:[%s1755_s28 + $0x68] sm:$0xff] %v1251_v25  ;;  %v883_v31 = vadd.f32 %v851_v59, %v1618_v11  ;;  %v884_v18 = vadd.f32 %v852_v17, %v1622_v5  ;;  %v858_v26 = vadd.f32 %v826_v24, %v1716_v28  ;;  %v823_v51 = vmul.f32 %v789_v42, %v1610_v3 }
  0xf4   : > { %v1253_v43 = vpop.eup %1252  ;;  %v648_v44 = vadd.f32 %v1662_v48, %v1654_v39  ;;  %1268 = vpow2.f32 %v943_v50  ;;  %v889_v29 = vadd.f32 %v857_v9, %v1618_v11  ;;  %v824_v27 = vmul.f32 %v789_v42, %v1612_v4 }
  0xf5   : > { %v1255_v53 = vpop.eup %1254  ;;  %973 = vst [vmem:[%s1755_s28 + $0x90] sm:$0xff] %v1253_v43  ;;  %1270 = vpow2.f32 %v945_v52  ;;  %v939_v32 = vmul.f32 1.442695, %v883_v31  ;;  %v941_v10 = vmul.f32 1.442695, %v884_v18  ;;  %v890_v28 = vadd.f32 %v858_v26, %v1622_v5 }
  0xf6   : > { %v1257_v30 = vpop.eup %1256  ;;  %974 = vst [vmem:[%s1755_s28 + $0x98] sm:$0xff] %v1255_v53  ;;  %v951_v3 = vmul.f32 1.442695, %v889_v29  ;;  %v855_v39 = vadd.f32 %v823_v51, %v1727_v58  ;;  %v856_v48 = vadd.f32 %v824_v27, %v648_v44 }
  0xf7   : > { %v1259_v54 = vpop.eup %1258  ;;  %971 = vst [vmem:[%s1755_s28 + $0x80] sm:$0xff] %v1257_v30  ;;  %1272 = vpow2.f32 %v939_v32  ;;  %v953_v4 = vmul.f32 1.442695, %v890_v28 }
  0xf8   : > { %972 = vst [vmem:[%s1755_s28 + $0x88] sm:$0xff] %v1259_v54  ;;  %1274 = vpow2.f32 %v941_v10  ;;  %v887_v33 = vadd.f32 %v855_v39, %v1618_v11  ;;  %v888_v57 = vadd.f32 %v856_v48, %v1622_v5 }
  0xf9   : > { %v1261_v34 = vpop.eup %1260  ;;  %1276 = vpow2.f32 %v951_v3 }
  0xfa   : > { %v1263_v35 = vpop.eup %1262  ;;  %977 = vst [vmem:[%s1755_s28 + $0xb0] sm:$0xff] %v1261_v34  ;;  %1278 = vpow2.f32 %v953_v4  ;;  %v947_v58 = vmul.f32 1.442695, %v887_v33  ;;  %v949_v36 = vmul.f32 1.442695, %v888_v57 }
  0xfb   : > { %v1265_v61 = vpop.eup %1264  ;;  %978 = vst [vmem:[%s1755_s28 + $0xb8] sm:$0xff] %v1263_v35 }
  0xfc   : > { %v1267_v37 = vpop.eup %1266  ;;  %975 = vst [vmem:[%s1755_s28 + $0xa0] sm:$0xff] %v1265_v61  ;;  %1280 = vpow2.f32 %v947_v58 }
  0xfd   : > { %976 = vst [vmem:[%s1755_s28 + $0xa8] sm:$0xff] %v1267_v37  ;;  %1282 = vpow2.f32 %v949_v36 }
  0xfe   : > { %v1269_v11 = vpop.eup %1268 }
  0xff   : > { %v1271_v5 = vpop.eup %1270  ;;  %981 = vst [vmem:[%s1755_s28 + $0xd0] sm:$0xff] %v1269_v11 }
 0x100   : > { %982 = vst [vmem:[%s1755_s28 + $0xd8] sm:$0xff] %v1271_v5 }
 0x101   : > { %v1273_v62 = vpop.eup %1272 }
 0x102   : > { %v1275_v38 = vpop.eup %1274  ;;  %979 = vst [vmem:[%s1755_s28 + $0xc0] sm:$0xff] %v1273_v62 }
 0x103   : > { %v1277_v19 = vpop.eup %1276  ;;  %980 = vst [vmem:[%s1755_s28 + $0xc8] sm:$0xff] %v1275_v38 }
 0x104   : > { %v1279_v20 = vpop.eup %1278  ;;  %985 = vst [vmem:[%s1755_s28 + $0xf0] sm:$0xff] %v1277_v19 }
 0x105   : > { %986 = vst [vmem:[%s1755_s28 + $0xf8] sm:$0xff] %v1279_v20 }
 0x106   : > { %v1281_v8 = vpop.eup %1280 }
 0x107   : > { %v1283_v12 = vpop.eup %1282  ;;  %983 = vst [vmem:[%s1755_s28 + $0xe0] sm:$0xff] %v1281_v8 }
 0x108   : > { %984 = vst [vmem:[%s1755_s28 + $0xe8] sm:$0xff] %v1283_v12 }
 0x109   : > { %s1152_s5 = sshll.u32 %s1374_s19, 8  ;;  %s1017_s6 = sshll.u32 %s1755_s28, 4  ;;  %s1018_s6 = int_to_ptr.vmem [resolvable:$true] %s1017_s6 }
 0x10a   : > { %s1000_s9 = scalar_lea.hbm %s1882_s4, %s1152_s5  ;;  %s1321_s10 = smov 256  }
 0x10b   : > { %1153 = sst [smem:[#allocation5]] (%p1391_p5), %s1321_s10  ;;  %s1322_s30 = smov 512  }
 0x10c   : > { %1154 = sst [smem:[#allocation5 + $0x1]] (%p1391_p5), %s1322_s30  ;;  %s1323_s11 = smov 2  }
 0x10d   : > { %1155 = sst [smem:[#allocation5 + $0x2]] (%p1391_p5), %s1323_s11  ;;  %s1324_s12 = smov 128  }
 0x10e   : > { %1156 = sst [smem:[#allocation5 + $0x3]] (%p1391_p5), %s1324_s12  ;;  %s1325_s19 = smov 8  }
 0x10f   : > { %1157 = sst [smem:[#allocation5 + $0x4]] (%p1391_p5), %s1324_s12  ;;  %s1326_s13 = smov [#allocation4]  }
 0x110   : > { %1158 = sst [smem:[#allocation5 + $0x5]] (%p1391_p5), %s1325_s19  ;;  %s1327_s14 = smov 0  }
 0x111   : > { %1159 = dma.general (%p1391_p5), %s1018_s6, 4096, %s1000_s9, %s988_s29, %s1326_s13, [#allocation5], %s1327_s14, 0  }
 0x112 PF: > { %p1165_p11 = scmp.ge.s32.totalorder %s1318_s18, 2  ;;  %s1045_s20 = sand.u32 1, %s1306_s15  }
 0x113   : > { %s1046_s22 = scalar_lea.sflag [#allocation3], %s1045_s20 }
 0x114   : > { %p1162_p12 = pnand %p1165_p11, %p1395_p6 }
 0x116   : > { %1301 = dma.done.wait (!%p1162_p12), %s1046_s22, 4096  }
 0x117   : > { %1303 = vsyncadd (!%p1162_p12), %s1046_s22, 4294963200  ;;  %p14_p13 = scmp.ge.s32.totalorder %s1378_s21, 4   ;;  %s1889_s15 = smov %s1310_s16 }
 0x118   : > { %s1890_s16 = smov %s1314_s17  ;;  %s1891_s17 = smov %s1389_s24 }
 0x119   : > { %s1892_s18 = smov %s1378_s21  ;;  %16 = sbr.rel (!%p14_p13) target bundleno = 3 (0x3), region = 76 }
 0x120   :  { %1051 = vsyncpa [#allocation3], 1 }
 0x121   :  { %1053 = vsyncpa [#allocation3 + $0x1], 1 }

</bundles_post_ra>
